<compile_context>
chip_gen: v6e
topology: v6e:2x2x1
jax: 0.10.0
libtpu: 0.0.40
codegen_flags: <defaults>
</compile_context>

<pallas_src>
import functools

import jax
import jax.numpy as jnp
from jax.experimental import pallas as pl
from jax.experimental.pallas import tpu as pltpu


def _precision_kernel(yhat_ref, y_ref, out_ref, *, in_class, n_chan,
                      valid_b, valid_h, mask_b, mask_h):
    """Per-block TP / FP counts for class `in_class`.

    yhat_ref: (Bb, C, Th, W) logits, y_ref: (Bb, Th, W) int32 labels,
    out_ref:  (1, 1, 2) int32 in SMEM -> [TP, FP] for this grid step.
    """
    y = y_ref[...]                               # (Bb, Th, W)
    xc = yhat_ref[:, in_class, :, :]             # target-class logits

    # "class `in_class` wins the (first-occurrence) argmax" -- small static C, unrolled.
    pred_pos = None
    for c in range(n_chan):
        if c == in_class:
            continue
        other = yhat_ref[:, c, :, :]
        cmp = (xc > other) if c < in_class else (xc >= other)
        pred_pos = cmp if pred_pos is None else jnp.logical_and(pred_pos, cmp)
    if pred_pos is None:                         # degenerate C == 1
        pred_pos = jnp.ones(y.shape, dtype=jnp.bool_)

    is_cls = y == in_class
    is_bg = y == 0

    # Ragged-tail masking: only traced when the tile does not divide H / B, so the common
    # divisible case pays nothing.  Masking the label side is sufficient -- garbage logits
    # in out-of-bounds rows can never become TP/FP once the label tests are forced False.
    if mask_h:
        h_pos = (jax.lax.broadcasted_iota(jnp.int32, y.shape, 1)
                 + pl.program_id(1) * y.shape[1])
        ok = h_pos < valid_h
        is_cls = jnp.logical_and(is_cls, ok)
        is_bg = jnp.logical_and(is_bg, ok)
    if mask_b:
        b_pos = (jax.lax.broadcasted_iota(jnp.int32, y.shape, 0)
                 + pl.program_id(0) * y.shape[0])
        ok = b_pos < valid_b
        is_cls = jnp.logical_and(is_cls, ok)
        is_bg = jnp.logical_and(is_bg, ok)

    tp = jnp.logical_and(pred_pos, is_cls).astype(jnp.int32)
    fp = jnp.logical_and(pred_pos, is_bg).astype(jnp.int32)
    # Two plain cross-lane reductions; XLU work is hidden under the block DMA.
    out_ref[0, 0, 0] = jnp.sum(tp)
    out_ref[0, 0, 1] = jnp.sum(fp)


def _is_v7x():
    try:
        return "7" in jax.devices()[0].device_kind.lower()
    except Exception:  # defensive: never let device probing break the metric
        return False


def precision_class1(yhat, y, in_class=1, eps=1e-6, target_block_bytes=None):
    """JAX/Pallas equivalent of Precision_class1.forward (returns a float32 scalar)."""
    B, C, H, W = yhat.shape
    assert y.shape == (B, H, W), (yhat.shape, y.shape)
    eps = jnp.float32(eps)

    if in_class == 0:
        # torch: preds[preds != 0] = 0  => every pixel predicts class 0, so
        # TP == FP == count(y == 0).  No logits traffic needed at all.
        n0 = jnp.sum(y == 0).astype(jnp.float32)
        return n0 / (n0 + n0 + eps)

    if not 0 < in_class < C:
        raise ValueError(f"in_class={in_class} out of range for C={C}")

    # Labels: keep integer compares in the kernel; normalise dtype (no-op for int32 inputs).
    if y.dtype != jnp.int32:
        y = y.astype(jnp.int32)

    esize = jnp.dtype(yhat.dtype).itemsize
    LANE = 128
    SUB = 8 * max(1, 4 // esize)              # sublane granularity for yhat's dtype
    W_pad = pl.cdiv(W, LANE) * LANE           # budgeting only (VMEM lane padding)
    H_pad = pl.cdiv(H, SUB) * SUB
    row_bytes = C * W_pad * esize             # one sublane row of logits, all channels
    img_bytes = row_bytes * H_pad             # one whole image (all channels)

    v7x = _is_v7x()
    if target_block_bytes is None:
        # Pure HBM streaming: per-step logits bytes must dwarf the ~0.35 us step overhead.
        # ~2 MiB saturates v5e/v6e; v7x (~3.2 TB/s per TC) wants larger blocks.
        target_block_bytes = (4 << 20) if v7x else (2 << 20)

    if img_bytes >= target_block_bytes and H > SUB:
        Bb = 1
        Th = min(H, max(SUB, (target_block_bytes // row_bytes) // SUB * SUB))
    else:
        Th = H
        Bb = max(1, min(B, target_block_bytes // max(img_bytes, 1)))

    # v7x: actually shard across the two TensorCores (CORE_PARALLEL on the leading grid
    # axis); plain "parallel" semantics do not split the grid across cores.
    core_par = v7x and B >= 2 and hasattr(pltpu, "CORE_PARALLEL")
    if core_par:
        Bb = min(Bb, max(1, (B + 1) // 2))    # ensure the core-parallel axis has extent >= 2
    # TODO(synk): when B == 1 on v7x, split the H axis across the two cores instead.

    nb = pl.cdiv(B, Bb)
    nh = pl.cdiv(H, Th)
    mask_b = (B % Bb) != 0
    mask_h = (H % Th) != 0

    if core_par:
        dim_sem = (pltpu.CORE_PARALLEL, pltpu.ARBITRARY)
    else:
        dim_sem = ("parallel", "parallel")

    kernel = functools.partial(
        _precision_kernel, in_class=in_class, n_chan=C,
        valid_b=B, valid_h=H, mask_b=mask_b, mask_h=mask_h)

    partials = pl.pallas_call(
        kernel,
        out_shape=jax.ShapeDtypeStruct((nb, nh, 2), jnp.int32),
        grid=(nb, nh),
        in_specs=[
            pl.BlockSpec((Bb, C, Th, W), lambda i, j: (i, 0, j, 0)),
            pl.BlockSpec((Bb, Th, W), lambda i, j: (i, j, 0)),
        ],
        # Each grid step owns its own (TP, FP) SMEM slot -> no cross-step accumulation.
        out_specs=pl.BlockSpec((1, 1, 2), lambda i, j: (i, j, 0),
                               memory_space=pltpu.SMEM),
        compiler_params=pltpu.CompilerParams(
            dimension_semantics=dim_sem,
            # 2x(double-buffered input blocks) + elementwise temporaries stay well under
            # this on every generation (also raises v5e's 16 MiB scoped default).
            vmem_limit_bytes=32 * 1024 * 1024,
        ),
    )(yhat, y)

    tp = jnp.sum(partials[..., 0]).astype(jnp.float32)
    fp = jnp.sum(partials[..., 1]).astype(jnp.float32)
    return tp / (tp + fp + eps)


def _ref_precision(yhat, y, in_class, eps):
    """Pure-JAX mirror of the torch module (softmax + argmax + zeroing)."""
    probs = jax.nn.softmax(yhat.astype(jnp.float32), axis=1)
    preds = jnp.argmax(probs, axis=1)
    preds = jnp.where(preds == in_class, preds, 0)
    pos = preds == in_class
    tp = jnp.sum(pos & (y == in_class)).astype(jnp.float32)
    fp = jnp.sum(pos & (y == 0)).astype(jnp.float32)
    return tp / (tp + fp + jnp.float32(eps))


if __name__ == "__main__":
    key = jax.random.PRNGKey(0)
    k1, k2, k3, k4 = jax.random.split(key, 4)

    # Shapes implied by the module: (B, C, H, W) logits + (B, H, W) integer labels.
    B, C, H, W = 2, 4, 16, 16
    yhat = jax.random.normal(k1, (B, C, H, W), dtype=jnp.float32)
    y = jax.random.randint(k2, (B, H, W), 0, C, dtype=jnp.int32)

    out = precision_class1(yhat, y, in_class=1, eps=1e-6)
    out = jax.block_until_ready(out)
    ref = _ref_precision(yhat, y, in_class=1, eps=1e-6)
    assert jnp.allclose(out, ref, atol=1e-6), (out, ref)

    # Exercise the ragged-tail (H- and B-masking), all-channel and in_class==0 paths on an
    # awkward shape, forcing small blocks via target_block_bytes.
    B2, C2, H2, W2 = 3, 4, 20, 20
    yhat2 = jax.random.normal(k3, (B2, C2, H2, W2), dtype=jnp.float32)
    y2 = jax.random.randint(k4, (B2, H2, W2), 0, C2, dtype=jnp.int32)
    for in_cls, tgt in ((2, 4096), (1, 98304), (3, None), (0, None)):
        got = precision_class1(yhat2, y2, in_class=in_cls, target_block_bytes=tgt)
        got = jax.block_until_ready(got)
        want = _ref_precision(yhat2, y2, in_class=in_cls, eps=1e-6)
        assert jnp.allclose(got, want, atol=1e-6), (in_cls, got, want)

    print("KERNEL_OK")
</pallas_src>

<mosaic_0001>
module attributes {stable_mosaic.version = 11 : i64} {
  func.func @_precision_kernel(%arg0: i32, %arg1: i32, %arg2: memref<2x4x16x16xf32, #tpu.memory_space<vmem>>, %arg3: memref<2x16x16xi32, #tpu.memory_space<vmem>>, %arg4: memref<1x1x2xi32, #tpu.memory_space<smem>>) attributes {dimension_semantics = [#tpu.dimension_semantics<parallel>, #tpu.dimension_semantics<parallel>], iteration_bounds = array<i64: 1, 1>, scalar_prefetch = 0 : i64, scratch_operands = 0 : i64, tpu.core_type = #tpu.core_type<tc>, window_params = [{transform_indices = @transform_0, window_bounds = array<i64: 2, 4, 16, 16>}, {transform_indices = @transform_1, window_bounds = array<i64: 2, 16, 16>}, {transform_indices = @transform_2, window_bounds = array<i64: 1, 1, 2>}]} {
    %c0 = arith.constant 0 : index
    %c0_0 = arith.constant 0 : index
    %c0_1 = arith.constant 0 : index
    %0 = vector.load %arg3[%c0, %c0_0, %c0_1] : memref<2x16x16xi32, #tpu.memory_space<vmem>>, vector<2x16x16xi32>
    %c0_2 = arith.constant 0 : index
    %c1 = arith.constant 1 : index
    %c0_3 = arith.constant 0 : index
    %c0_4 = arith.constant 0 : index
    %1 = vector.load %arg2[%c0_2, %c1, %c0_3, %c0_4] : memref<2x4x16x16xf32, #tpu.memory_space<vmem>>, vector<2x1x16x16xf32>
    %2 = vector.shape_cast %1 : vector<2x1x16x16xf32> to vector<2x16x16xf32>
    %c0_5 = arith.constant 0 : index
    %c0_6 = arith.constant 0 : index
    %c0_7 = arith.constant 0 : index
    %c0_8 = arith.constant 0 : index
    %3 = vector.load %arg2[%c0_5, %c0_6, %c0_7, %c0_8] : memref<2x4x16x16xf32, #tpu.memory_space<vmem>>, vector<2x1x16x16xf32>
    %4 = vector.shape_cast %3 : vector<2x1x16x16xf32> to vector<2x16x16xf32>
    %5 = arith.cmpf ogt, %2, %4 : vector<2x16x16xf32>
    %c0_9 = arith.constant 0 : index
    %c2 = arith.constant 2 : index
    %c0_10 = arith.constant 0 : index
    %c0_11 = arith.constant 0 : index
    %6 = vector.load %arg2[%c0_9, %c2, %c0_10, %c0_11] : memref<2x4x16x16xf32, #tpu.memory_space<vmem>>, vector<2x1x16x16xf32>
    %7 = vector.shape_cast %6 : vector<2x1x16x16xf32> to vector<2x16x16xf32>
    %8 = arith.cmpf oge, %2, %7 : vector<2x16x16xf32>
    %9 = arith.andi %5, %8 : vector<2x16x16xi1>
    %c0_12 = arith.constant 0 : index
    %c3 = arith.constant 3 : index
    %c0_13 = arith.constant 0 : index
    %c0_14 = arith.constant 0 : index
    %10 = vector.load %arg2[%c0_12, %c3, %c0_13, %c0_14] : memref<2x4x16x16xf32, #tpu.memory_space<vmem>>, vector<2x1x16x16xf32>
    %11 = vector.shape_cast %10 : vector<2x1x16x16xf32> to vector<2x16x16xf32>
    %12 = arith.cmpf oge, %2, %11 : vector<2x16x16xf32>
    %13 = arith.andi %9, %12 : vector<2x16x16xi1>
    %c1_i32 = arith.constant 1 : i32
    %14 = vector.broadcast %c1_i32 : i32 to vector<2x16x16xi32>
    %15 = arith.cmpi eq, %0, %14 : vector<2x16x16xi32>
    %c0_i32 = arith.constant 0 : i32
    %16 = vector.broadcast %c0_i32 : i32 to vector<2x16x16xi32>
    %17 = arith.cmpi eq, %0, %16 : vector<2x16x16xi32>
    %18 = arith.andi %13, %15 : vector<2x16x16xi1>
    %19 = arith.extui %18 : vector<2x16x16xi1> to vector<2x16x16xi32>
    %20 = arith.andi %13, %17 : vector<2x16x16xi1>
    %21 = arith.extui %20 : vector<2x16x16xi1> to vector<2x16x16xi32>
    %22 = vector.shape_cast %19 : vector<2x16x16xi32> to vector<1x2x16x16xi32>
    %cst = arith.constant dense<0> : vector<1xi32>
    %23 = vector.multi_reduction <add>, %22, %cst [1, 2, 3] : vector<1x2x16x16xi32> to vector<1xi32>
    %24 = vector.shape_cast %23 : vector<1xi32> to vector<1x1x1x1xi32>
    %25 = vector.extract %24[0, 0, 0, 0] : i32 from vector<1x1x1x1xi32>
    %c0_15 = arith.constant 0 : index
    %c0_16 = arith.constant 0 : index
    %c0_17 = arith.constant 0 : index
    %26 = memref.load %arg4[%c0_15, %c0_16, %c0_17] : memref<1x1x2xi32, #tpu.memory_space<smem>>
    memref.store %25, %arg4[%c0_15, %c0_16, %c0_17] : memref<1x1x2xi32, #tpu.memory_space<smem>>
    %27 = vector.shape_cast %21 : vector<2x16x16xi32> to vector<1x2x16x16xi32>
    %cst_18 = arith.constant dense<0> : vector<1xi32>
    %28 = vector.multi_reduction <add>, %27, %cst_18 [1, 2, 3] : vector<1x2x16x16xi32> to vector<1xi32>
    %29 = vector.shape_cast %28 : vector<1xi32> to vector<1x1x1x1xi32>
    %30 = vector.extract %29[0, 0, 0, 0] : i32 from vector<1x1x1x1xi32>
    %c0_19 = arith.constant 0 : index
    %c0_20 = arith.constant 0 : index
    %c1_21 = arith.constant 1 : index
    %31 = memref.load %arg4[%c0_19, %c0_20, %c1_21] : memref<1x1x2xi32, #tpu.memory_space<smem>>
    memref.store %30, %arg4[%c0_19, %c0_20, %c1_21] : memref<1x1x2xi32, #tpu.memory_space<smem>>
    return
  }
  func.func @transform_0(%arg0: i32, %arg1: i32) -> (i32, i32, i32, i32) {
    %c0_i32 = arith.constant 0 : i32
    %c0_i32_0 = arith.constant 0 : i32
    %c0_i32_1 = arith.constant 0 : i32
    return %arg0, %c0_i32, %arg1, %c0_i32_0 : i32, i32, i32, i32
  }
  func.func @transform_1(%arg0: i32, %arg1: i32) -> (i32, i32, i32) {
    %c0_i32 = arith.constant 0 : i32
    %c0_i32_0 = arith.constant 0 : i32
    return %arg0, %arg1, %c0_i32 : i32, i32, i32
  }
  func.func @transform_2(%arg0: i32, %arg1: i32) -> (i32, i32, i32) {
    %c0_i32 = arith.constant 0 : i32
    %c0_i32_0 = arith.constant 0 : i32
    return %arg0, %arg1, %c0_i32 : i32, i32, i32
  }
}

</mosaic_0001>

<bundles_post_ra>
// kernel: tpu_custom_call.1
= control target key start
LH: loop header
LB: loop body
LE: loop exit
PB: predicated region body
PF: predicated region fallthrough
CT: control target
= control target key end

     0   :  { %7 = vsyncpa [#allocation3], 0  ;;  %s315_s0 = inlined_call_operand.hbm [shape: f32[2,4,16,16], index: 0, kind: input, shape index: {}]   ;;  %s316_s1 = inlined_call_operand.hbm [shape: s32[2,16,16], index: 1, kind: input, shape index: {}]   ;;  %s317_s2 = inlined_call_operand.hbm [shape: s32[1,1,2], index: 2, kind: output, shape index: {}]  }
   0x1   :  { %8 = vsyncpa [#allocation6], 0 }
   0x2   :  { %9 = vsyncpa [#allocation4], 0  ;;  %s243_s9 = smov [#allocation2]  }
   0x3   :  { %s15_s10 = sshll.u32 %s243_s9, 4  ;;  %s16_s10 = int_to_ptr.vmem [resolvable:$true] %s15_s10 }
   0x4   :  { %s197_s11 = scalar_lea.vmem %s16_s10, 2048  ;;  %p202_p1 = scmp.lt.s32.totalorder %s16_s10, %s16_s10 }
   0x5   :  { %p198_p0 = scmp.ne.s32.totalorder %s16_s10, %s197_s11  ;;  %p203_p2 = scmp.lt.s32.totalorder %s197_s11, %s197_s11 }
   0x7   :  { %p204_p3 = por %p203_p2, %p202_p1 }
   0x9   :  { %p205_p4 = pnand %p204_p3, %p198_p0 }
   0xb   :  { %208 = shalt.err (!%p205_p4)
}
   0xc   :  { %s244_s12 = smov 128   ;;  %s245_s13 = smov 8  }
   0xd   :  { %21 = dma.hbm_to_vmem [thread:$0]  %s315_s0, 2048, %s16_s10, [#allocation3], %s244_s12, %s244_s12, %s245_s13  }
   0xe   :  { %s246_s16 = smov [#allocation5]  }
   0xf   :  { %s27_s17 = sshll.u32 %s246_s16, 4  ;;  %s28_s17 = int_to_ptr.vmem [resolvable:$true] %s27_s17 }
  0x10   :  { %s217_s18 = scalar_lea.vmem %s28_s17, 512  ;;  %p222_p6 = scmp.lt.s32.totalorder %s28_s17, %s28_s17 }
  0x11   :  { %p218_p5 = scmp.ne.s32.totalorder %s28_s17, %s217_s18  ;;  %p223_p7 = scmp.lt.s32.totalorder %s217_s18, %s217_s18 }
  0x13   :  { %p224_p8 = por %p223_p7, %p222_p6 }
  0x15   :  { %p225_p9 = pnand %p224_p8, %p218_p5 }
  0x17   :  { %228 = shalt.err (!%p225_p9)
}
  0x18   :  { %33 = dma.hbm_to_vmem [thread:$0]  %s316_s1, 512, %s28_s17, [#allocation6], %s244_s12, %s244_s12, %s245_s13  }
  0x19   :  { %237 = dma.done.wait [#allocation3], 2048  }
  0x1a   :  { %238 = vsyncadd [#allocation3], 4294965248 }
  0x1b   :  { %239 = dma.done.wait [#allocation6], 512  }
  0x1c   :  { %240 = vsyncadd [#allocation6], 4294966784  ;;  %v45_v0 = vld [vmem:[#allocation2 + $0x10] sm:$0xff]  ;;  %v46_v1 = vld [vmem:[#allocation2 + $0x18] sm:$0xff]  ;;  %v247_v24 = vmov 0   ;;  %s248_s21 = smov [#allocation7]  }
  0x1d   :  { %v47_v2 = vld [vmem:[#allocation2 + $0x50] sm:$0xff]  ;;  %v48_v3 = vld [vmem:[#allocation2 + $0x58] sm:$0xff]  ;;  %v49_v4 = vld [vmem:[#allocation2] sm:$0xff] }
  0x1e   :  { %v50_v5 = vld [vmem:[#allocation2 + $0x8] sm:$0xff]  ;;  %v51_v6 = vld [vmem:[#allocation2 + $0x40] sm:$0xff]  ;;  %vm53_vm0 = vcmp.gt.f32.partialorder %v45_v0, %v49_v4  ;;  %v71_v12 = vld [vmem:[#allocation2 + $0x30] sm:$0xff] }
  0x1f   :  { %v52_v7 = vld [vmem:[#allocation2 + $0x48] sm:$0xff]  ;;  %vm54_vm1 = vcmp.gt.f32.partialorder %v46_v1, %v50_v5  ;;  %v58_v8 = vld [vmem:[#allocation2 + $0x20] sm:$0xff]  ;;  %vm55_vm2 = vcmp.gt.f32.partialorder %v47_v2, %v51_v6  ;;  %v72_v13 = vld [vmem:[#allocation2 + $0x38] sm:$0xff]  ;;  %vm75_vm10 = vcmp.ge.f32.partialorder %v45_v0, %v71_v12 }
  0x20   :  { %v59_v9 = vld [vmem:[#allocation2 + $0x28] sm:$0xff]  ;;  %v60_v10 = vld [vmem:[#allocation2 + $0x60] sm:$0xff]  ;;  %vm62_vm3 = vcmp.ge.f32.partialorder %v45_v0, %v58_v8  ;;  %vm56_vm6 = vcmp.gt.f32.partialorder %v48_v3, %v52_v7  ;;  %v73_v14 = vld [vmem:[#allocation2 + $0x70] sm:$0xff]  ;;  %vm76_vm12 = vcmp.ge.f32.partialorder %v46_v1, %v72_v13 }
  0x21   :  { %v61_v11 = vld [vmem:[#allocation2 + $0x68] sm:$0xff]  ;;  %vm63_vm4 = vcmp.ge.f32.partialorder %v46_v1, %v59_v9  ;;  %vm64_vm5 = vcmp.ge.f32.partialorder %v47_v2, %v60_v10  ;;  %vm66_vm8 = vmand %vm53_vm0, %vm62_vm3  ;;  %v74_v15 = vld [vmem:[#allocation2 + $0x78] sm:$0xff]  ;;  %vm77_vm14 = vcmp.ge.f32.partialorder %v47_v2, %v73_v14 }
  0x22   :  { %vm65_vm7 = vcmp.ge.f32.partialorder %v48_v3, %v61_v11  ;;  %vm67_vm9 = vmand %vm54_vm1, %vm63_vm4  ;;  %v40_v16 = vld [vmem:[#allocation5] sm:$0xff]  ;;  %v41_v17 = vld [vmem:[#allocation5 + $0x8] sm:$0xff]  ;;  %vm78_vm15 = vcmp.ge.f32.partialorder %v48_v3, %v74_v15 }
  0x23   :  { %vm68_vm11 = vmand %vm55_vm2, %vm64_vm5  ;;  %v42_v18 = vld [vmem:[#allocation5 + $0x10] sm:$0xff]  ;;  %v43_v20 = vld [vmem:[#allocation5 + $0x18] sm:$0xff]  ;;  %vm83_vm1 = vcmp.eq.s32.totalorder %v40_v16, 1  ;;  %vm84_vm2 = vcmp.eq.s32.totalorder %v41_v17, 1 }
  0x24   :  { %vm69_vm13 = vmand %vm56_vm6, %vm65_vm7  ;;  %vm85_vm6 = vcmp.eq.s32.totalorder %v42_v18, 1  ;;  %vm107_vm7 = vcmask 130048  }
  0x25   :  { %vm272_vm0 = vmand %vm66_vm8, %vm75_vm10  ;;  %vm86_vm8 = vcmp.eq.s32.totalorder %v43_v20, 1 }
  0x26   :  { %vm276_vm3 = vmand %vm67_vm9, %vm76_vm12 }
  0x27   :  { %vm280_vm4 = vmand %vm68_vm11, %vm77_vm14  ;;  %vm87_vm11 = vcmp.eq.s32.totalorder %v40_v16, 0 }
  0x28   :  { %vm284_vm5 = vmand %vm69_vm13, %vm78_vm15  ;;  %vm88_vm13 = vcmp.eq.s32.totalorder %v41_v17, 0  ;;  %vm89_vm15 = vcmp.eq.s32.totalorder %v42_v18, 0 }
  0x29   :  { %vm91_vm10 = vmand %vm272_vm0, %vm83_vm1  ;;  %vm90_vm1 = vcmp.eq.s32.totalorder %v43_v20, 0 }
  0x2a   :  { %vm92_vm9 = vmand %vm276_vm3, %vm84_vm2  ;;  %v95_v25 = vsel %vm91_vm10, 1, %v247_v24 }
  0x2b   :  { %vm93_vm12 = vmand %vm280_vm4, %vm85_vm6  ;;  %v96_v26 = vsel %vm92_vm9, 1, %v247_v24  ;;  %v108_v27 = vsel %vm107_vm7, %v95_v25, 0 }
  0x2c   :  { %vm94_vm14 = vmand %vm284_vm5, %vm86_vm8  ;;  %v97_v28 = vsel %vm93_vm12, 1, %v247_v24  ;;  %v109_v29 = vsel %vm107_vm7, %v96_v26, 0 }
  0x2d   :  { %v98_v30 = vsel %vm94_vm14, 1, %v247_v24  ;;  %v110_v31 = vsel %vm107_vm7, %v97_v28, 0  ;;  %v112_v32 = vadd.s32 %v109_v29, %v108_v27  ;;  %vm99_vm2 = vmand %vm272_vm0, %vm87_vm11 }
  0x2e   :  { %v111_v33 = vsel %vm107_vm7, %v98_v30, 0  ;;  %vm100_vm6 = vmand %vm276_vm3, %vm88_vm13  ;;  %v103_v34 = vsel %vm99_vm2, 1, %v247_v24 }
  0x2f   :  { %v113_v35 = vadd.s32 %v111_v33, %v110_v31  ;;  %vm101_vm8 = vmand %vm280_vm4, %vm89_vm15  ;;  %v104_v36 = vsel %vm100_vm6, 1, %v247_v24  ;;  %v136_v37 = vsel %vm107_vm7, %v103_v34, 0 }
  0x30   :  { %vm102_vm10 = vmand %vm284_vm5, %vm90_vm1  ;;  %v105_v38 = vsel %vm101_vm8, 1, %v247_v24  ;;  %v137_v39 = vsel %vm107_vm7, %v104_v36, 0 }
  0x31   :  { %v114_v40 = vadd.s32 %v113_v35, %v112_v32  ;;  %v106_v41 = vsel %vm102_vm10, 1, %v247_v24  ;;  %v138_v42 = vsel %vm107_vm7, %v105_v38, 0  ;;  %v140_v43 = vadd.s32 %v137_v39, %v136_v37 }
  0x32   :  { %v139_v44 = vsel %vm107_vm7, %v106_v41, 0 }
  0x33   :  { %v116_v45 = vshrl.u32 %v114_v40, 16  ;;  %v115_v46 = vand.u32 65535, %v114_v40  ;;  %v141_v47 = vadd.s32 %v139_v44, %v138_v42 }
  0x35   :  { %v118_v48 = vcvt.s32.f32 %v116_v45  ;;  %v117_v49 = vcvt.s32.f32 %v115_v46  ;;  %v142_v50 = vadd.s32 %v141_v47, %v140_v43 }
  0x37   :  { %121 = vadd.xlane.f32.xlu0 %v118_v48  ;;  %119 = vadd.xlane.f32.xlu1 %v117_v49  ;;  %v144_v51 = vshrl.u32 %v142_v50, 16  ;;  %v143_v52 = vand.u32 65535, %v142_v50 }
  0x39   :  { %v146_v53 = vcvt.s32.f32 %v144_v51  ;;  %v145_v54 = vcvt.s32.f32 %v143_v52 }
  0x3b   :  { %149 = vadd.xlane.f32.xlu0 %v146_v53  ;;  %147 = vadd.xlane.f32.xlu1 %v145_v54 }
  0xc0   :  { %v122_v55 = vpop.xlane.xlu0 %121  ;;  %v120_v56 = vpop.xlane.xlu1 %119 }
  0xc1   :  { %v124_v57 = vcvt.f32.s32 %v122_v55  ;;  %v123_v58 = vcvt.f32.s32 %v120_v56 }
  0xc3   :  { %v125_v59 = vshll.u32 %v124_v57, 16 }
  0xc4   :  { %v150_v60 = vpop.xlane.xlu0 %149  ;;  %v148_v61 = vpop.xlane.xlu1 %147 }
  0xc5   :  { %v126_v62 = vadd.s32 %v125_v59, %v123_v58  ;;  %v152_v63 = vcvt.f32.s32 %v150_v60  ;;  %v151_v0 = vcvt.f32.s32 %v148_v61 }
  0xc7   :  { %v127_v1 = vrot.slane %v126_v62, 4  ;;  %v153_v2 = vshll.u32 %v152_v63, 16 }
  0xc9   :  { %v154_v3 = vadd.s32 %v153_v2, %v151_v0  ;;  %v128_v4 = vadd.s32 %v127_v1, %v126_v62 }
  0xcb   :  { %v155_v5 = vrot.slane %v154_v3, 4  ;;  %v129_v6 = vrot.slane %v128_v4, 2 }
  0xcd   :  { %v156_v7 = vadd.s32 %v155_v5, %v154_v3  ;;  %v130_v8 = vadd.s32 %v129_v6, %v128_v4 }
  0xcf   :  { %v131_v9 = vrot.slane %v130_v8, 1  ;;  %v157_v10 = vrot.slane %v156_v7, 2 }
  0xd1   :  { %v132_v11 = vadd.s32 %v131_v9, %v130_v8  ;;  %v158_v12 = vadd.s32 %v157_v10, %v156_v7 }
  0xd3   :  { %179 = vpush %v132_v11  ;;  %v159_v13 = vrot.slane %v158_v12, 1 }
  0xd5   :  { %v160_v14 = vadd.s32 %v159_v13, %v158_v12 }
  0xd7   :  { %181 = vpush %v160_v14 }
 0x104   :  { %s180_s0 = spop %179 }
 0x105   :  { %135 = sst [smem:[#allocation7]] %s180_s0 }
 0x108   :  { %s182_s1 = spop %181 }
 0x109   :  { %163 = sst [smem:[#allocation7 + $0x1]] %s182_s1 }
 0x10a   :  { %171 = dma.smem_to_hbm %s248_s21, 16, %s317_s2, [#allocation4]  }
 0x10b   :  { %241 = dma.done.wait [#allocation4], 16  }
 0x10c   :  { %242 = vsyncadd [#allocation4], 4294967280 }
 0x10d   :  { %175 = sfence }
 0x10e   :  { %176 = vsyncpa [#allocation3], 1 }
 0x10f   :  { %177 = vsyncpa [#allocation6], 1 }
 0x110   :  { %178 = vsyncpa [#allocation4], 1 }

</bundles_post_ra>
